<compile_context>
chip_gen: v7x
topology: tpu7x:2x2x1
jax: 0.10.0
libtpu: 0.0.40
codegen_flags: <defaults>
</compile_context>

<pallas_src>
import functools

import jax
import jax.numpy as jnp
from jax import lax
from jax.experimental import pallas as pl
from jax.experimental.pallas import tpu as pltpu


def _blur2d_kernel(x_ref, o_ref, *, taps_h, taps_w, scale):
    """Separable blur of a (Bblk, H, W) tile of independent channel planes."""
    x = x_ref[...].astype(jnp.float32)            # (B, H, W), f32 accumulation
    ph = (len(taps_h) - 1) // 2
    pw = (len(taps_w) - 1) // 2

    def shifted(v, d, axis):
        # out[i] = v[i + d] along `axis`, zero-filled outside the valid range.
        if d == 0:
            return v
        n = v.shape[axis]
        zshape = list(v.shape)
        zshape[axis] = abs(d)
        zeros = jnp.zeros(zshape, v.dtype)
        if d > 0:
            body = lax.slice_in_dim(v, d, n, axis=axis)
            return jnp.concatenate([body, zeros], axis=axis)
        body = lax.slice_in_dim(v, 0, n + d, axis=axis)
        return jnp.concatenate([zeros, body], axis=axis)

    def weighted(c, v):
        # Power-of-two taps need no multiply (add-only fast path on the VPU).
        if c == 1.0:
            return v
        if c == 2.0:
            return v + v
        return c * v

    # Horizontal pass (W axis).
    t = None
    for j, c in enumerate(taps_w):
        contrib = weighted(c, shifted(x, j - pw, axis=2))
        t = contrib if t is None else t + contrib
    # Vertical pass (H axis).
    acc = None
    for i, c in enumerate(taps_h):
        contrib = weighted(c, shifted(t, i - ph, axis=1))
        acc = contrib if acc is None else acc + contrib
    # Single normalization multiply at the end.
    if scale != 1.0:
        acc = acc * scale

    o_ref[...] = acc.astype(o_ref.dtype)


def _pick_plane_block(nc, plane_bytes, tile_budget=4 * 1024 * 1024):
    """Largest divisor of nc whose f32 tile fits the budget; prefer >=2 steps."""
    max_b = max(1, tile_budget // max(plane_bytes, 1))
    divisors = [d for d in range(1, nc + 1) if nc % d == 0 and d <= max_b]
    if not divisors:
        divisors = [1]
    if nc >= 2:
        multi = [d for d in divisors if nc // d >= 2]
        if multi:
            divisors = multi
    return max(divisors)


def blur2d(x, f=(1, 2, 1), normalize=True, flip=False, stride=1):
    """Depthwise blur of NCHW `x` with the separable 1-D taps `f`."""
    if f is None:
        return x
    assert isinstance(stride, int) and stride >= 1
    assert stride == 1  # TODO(synk): stride > 1 not implemented (module default is 1).

    taps = [float(v) for v in f]
    assert len(taps) % 2 == 1, "odd tap count required for SAME alignment"
    if flip:
        taps = taps[::-1]
    # outer(f, f) / sum(outer(f, f)) == outer(f, f) * 1/(sum f)^2
    scale = (1.0 / (sum(taps) ** 2)) if normalize else 1.0

    N, C, H, W = x.shape
    NC = N * C
    xr = x.reshape(NC, H, W)                       # free reshape (merge leading dims)

    bblk = _pick_plane_block(NC, H * W * 4)
    grid = (NC // bblk,)

    kernel = functools.partial(
        _blur2d_kernel, taps_h=tuple(taps), taps_w=tuple(taps), scale=scale)

    yr = pl.pallas_call(
        kernel,
        out_shape=jax.ShapeDtypeStruct((NC, H, W), x.dtype),
        grid_spec=pltpu.PrefetchScalarGridSpec(
            num_scalar_prefetch=0,
            grid=grid,
            in_specs=[pl.BlockSpec((bblk, H, W), lambda b: (b, 0, 0))],
            out_specs=pl.BlockSpec((bblk, H, W), lambda b: (b, 0, 0)),
        ),
        compiler_params=pltpu.CompilerParams(
            dimension_semantics=("parallel",),
            vmem_limit_bytes=48 * 1024 * 1024,
        ),
    )(xr)
    return yr.reshape(N, C, H, W)


if __name__ == "__main__":
    key = jax.random.PRNGKey(0)
    x = jax.random.normal(key, (2, 4, 16, 16), dtype=jnp.float32)

    y = jax.block_until_ready(blur2d(x, f=[1, 2, 1], normalize=True, flip=False, stride=1))

    # Reference: XLA depthwise conv (intended F.conv2d semantics).
    N, C, H, W = x.shape
    f1 = jnp.asarray([1.0, 2.0, 1.0], jnp.float32)
    f2 = f1[:, None] * f1[None, :]
    f2 = f2 / jnp.sum(f2)
    w = jnp.broadcast_to(f2[None, None, :, :], (C, 1, 3, 3))
    y_ref = jax.lax.conv_general_dilated(
        x, w, window_strides=(1, 1), padding="SAME",
        dimension_numbers=("NCHW", "OIHW", "NCHW"),
        feature_group_count=C)

    assert y.shape == x.shape and y.dtype == x.dtype
    assert jnp.allclose(y, y_ref, atol=1e-5, rtol=1e-5), "mismatch vs reference"

    print("KERNEL_OK")
</pallas_src>

<mosaic_0001>
module attributes {stable_mosaic.version = 11 : i64} {
  func.func @_blur2d_kernel(%arg0: i32, %arg1: memref<4x16x16xf32, #tpu.memory_space<vmem>>, %arg2: memref<4x16x16xf32, #tpu.memory_space<vmem>>) attributes {dimension_semantics = [#tpu.dimension_semantics<parallel>], iteration_bounds = array<i64: 2>, scalar_prefetch = 0 : i64, scratch_operands = 0 : i64, tpu.core_type = #tpu.core_type<tc>, window_params = [{transform_indices = @transform_0, window_bounds = array<i64: 4, 16, 16>}, {transform_indices = @transform_1, window_bounds = array<i64: 4, 16, 16>}]} {
    %c0 = arith.constant 0 : index
    %c0_0 = arith.constant 0 : index
    %c0_1 = arith.constant 0 : index
    %0 = vector.load %arg1[%c0, %c0_0, %c0_1] : memref<4x16x16xf32, #tpu.memory_space<vmem>>, vector<4x16x16xf32>
    %cst = arith.constant 0.000000e+00 : f32
    %1 = vector.broadcast %cst : f32 to vector<4x16x1xf32>
    %2 = vector.extract_strided_slice %0 {offsets = [0, 0, 0], sizes = [4, 16, 15], strides = [1, 1, 1]} : vector<4x16x16xf32> to vector<4x16x15xf32>
    %3 = tpu.concatenate %1, %2 in 2 : vector<4x16x1xf32>, vector<4x16x15xf32> -> vector<4x16x16xf32>
    %4 = arith.addf %0, %0 : vector<4x16x16xf32>
    %5 = arith.addf %3, %4 : vector<4x16x16xf32>
    %cst_2 = arith.constant 0.000000e+00 : f32
    %6 = vector.broadcast %cst_2 : f32 to vector<4x16x1xf32>
    %7 = vector.extract_strided_slice %0 {offsets = [0, 0, 1], sizes = [4, 16, 15], strides = [1, 1, 1]} : vector<4x16x16xf32> to vector<4x16x15xf32>
    %8 = tpu.concatenate %7, %6 in 2 : vector<4x16x15xf32>, vector<4x16x1xf32> -> vector<4x16x16xf32>
    %9 = arith.addf %5, %8 : vector<4x16x16xf32>
    %cst_3 = arith.constant 0.000000e+00 : f32
    %10 = vector.broadcast %cst_3 : f32 to vector<4x1x16xf32>
    %11 = vector.extract_strided_slice %9 {offsets = [0, 0, 0], sizes = [4, 15, 16], strides = [1, 1, 1]} : vector<4x16x16xf32> to vector<4x15x16xf32>
    %12 = tpu.concatenate %10, %11 in 1 : vector<4x1x16xf32>, vector<4x15x16xf32> -> vector<4x16x16xf32>
    %13 = arith.addf %9, %9 : vector<4x16x16xf32>
    %14 = arith.addf %12, %13 : vector<4x16x16xf32>
    %cst_4 = arith.constant 0.000000e+00 : f32
    %15 = vector.broadcast %cst_4 : f32 to vector<4x1x16xf32>
    %16 = vector.extract_strided_slice %9 {offsets = [0, 1, 0], sizes = [4, 15, 16], strides = [1, 1, 1]} : vector<4x16x16xf32> to vector<4x15x16xf32>
    %17 = tpu.concatenate %16, %15 in 1 : vector<4x15x16xf32>, vector<4x1x16xf32> -> vector<4x16x16xf32>
    %18 = arith.addf %14, %17 : vector<4x16x16xf32>
    %cst_5 = arith.constant 6.250000e-02 : f32
    %19 = vector.broadcast %cst_5 : f32 to vector<4x16x16xf32>
    %20 = arith.mulf %18, %19 : vector<4x16x16xf32>
    %c0_6 = arith.constant 0 : index
    %c0_7 = arith.constant 0 : index
    %c0_8 = arith.constant 0 : index
    %21 = vector.load %arg2[%c0_6, %c0_7, %c0_8] : memref<4x16x16xf32, #tpu.memory_space<vmem>>, vector<4x16x16xf32>
    tpu.vector_store %arg2[%c0_6, %c0_7, %c0_8], %20 {strides = array<i32>} : memref<4x16x16xf32, #tpu.memory_space<vmem>>, vector<4x16x16xf32>,
    return
  }
  func.func @transform_0(%arg0: i32) -> (i32, i32, i32) {
    %c0_i32 = arith.constant 0 : i32
    %c0_i32_0 = arith.constant 0 : i32
    %c0_i32_1 = arith.constant 0 : i32
    return %arg0, %c0_i32, %c0_i32_0 : i32, i32, i32
  }
  func.func @transform_1(%arg0: i32) -> (i32, i32, i32) {
    %c0_i32 = arith.constant 0 : i32
    %c0_i32_0 = arith.constant 0 : i32
    %c0_i32_1 = arith.constant 0 : i32
    return %arg0, %c0_i32, %c0_i32_0 : i32, i32, i32
  }
}

</mosaic_0001>

<bundles_post_ra>
// kernel: tpu_custom_call.1
= control target key start
LH: loop header
LB: loop body
LE: loop exit
PB: predicated region body
PF: predicated region fallthrough
CT: control target
= control target key end

     0   :  { %6 = vsyncpa [#allocation3], 0  ;;  %s836_s0 = inlined_call_operand.hbm [shape: f32[8,16,16], index: 0, kind: input, shape index: {}]   ;;  %s837_s1 = inlined_call_operand.hbm [shape: f32[8,16,16], index: 1, kind: output, shape index: {}]  }
   0x1   :  { %8 = vsyncpa [#allocation3 + $0x1], 0 }
   0x2   :  { %9 = vsyncpa [#allocation4], 0 }
   0x3   :  { %11 = vsyncpa [#allocation4 + $0x1], 0  ;;  %s619_s6 = smov 0   ;;  %s621_s7 = smov 0  }
   0x4   :  { %s623_s8 = smov 0   ;;  %s625_s9 = smov 0  }
   0x5 LB: > { %s640_s10 = sadd.s32 4294967295, %s599_s9   ;;  %s431_s11 = sadd.s32 4294967294, %s599_s9   ;;  %s599_s9 = sphi %s625_s9, %s850_s9   ;;  %s595_s8 = sphi %s623_s8, %s849_s8   ;;  %s591_s7 = sphi %s621_s7, %s848_s7   ;;  %s587_s6 = sphi %s619_s6, %s847_s6  }
   0x6   : > { %s644_s12 = sadd.s32 1, %s599_s9   ;;  %s24_s13 = sadd.s32 1, %s595_s8 }
   0x7   : > { %s21_s14 = ssub.s32 %s599_s9, %s644_s12  ;;  %p31_p0 = scmp.ne.s32.totalorder %s595_s8, %s591_s7 }
   0x8   : > { %p22_p1 = scmp.eq.s32.totalorder %s21_s14, 0  ;;  %p32_p2 = scmp.eq.s32.totalorder %s599_s9, 0 }
   0x9   : > { %p37_p3 = scmp.ne.s32.totalorder %s591_s7, %s587_s6  ;;  %p38_p4 = scmp.eq.s32.totalorder %s640_s10, 0 }
   0xa   : > { %s656_s15 = scalar_select %p22_p1, %s595_s8, %s24_s13  }
   0xb   : > { %p658_p5 = por %p32_p2, %p31_p0  ;;  %p662_p6 = por %p38_p4, %p37_p3 }
   0xc   : > { %p61_p7 = scmp.eq.s32.totalorder %s640_s10, 1  ;;  %p67_p8 = scmp.eq.s32.totalorder %s431_s11, 1 }
   0xd   : > { %p463_p10 = scmp.lt.s32.totalorder %s599_s9, 2  ;;  %s87_s20 = sand.u32 1, %s595_s8  }
   0xe   : > { %p669_p11 = por %p61_p7, %p31_p0  ;;  %p673_p12 = por %p67_p8, %p37_p3 }
   0xf   : > { %s448_s21 = sshll.u32 %s599_s9, 10  ;;  %s434_s22 = sshll.u32 %s87_s20, 6 }
  0x10   : > { %s841_s18 = scalar_select %p669_p11, 1, 0 }
  0x11   : > { %s842_s19 = scalar_select %p673_p12, 1, 0 }
  0x12   : > { %s682_s25 = scalar_lea.hbm %s836_s0, %s448_s21  ;;  %s91_s26 = scalar_lea.vmem [#allocation2], %s434_s22 }
  0x13   : > { %s99_s27 = sshll.u32 %s91_s26, 4  ;;  %p686_p13 = pnand %p463_p10, %p658_p5  ;;  %s690_s27 = int_to_ptr.vmem [resolvable:$true] %s99_s27 }
  0x14   : > { %s692_s29 = scalar_lea.sflag [#allocation3], %s87_s20  ;;  %s503_s30 = scalar_lea.hbm %s682_s25, 1024 }
  0x15   : > { %p504_p0 = scmp.ne.s32.totalorder %s682_s25, %s503_s30  ;;  %p505_p1 = pneg %p686_p13 }
  0x16   : > { %s508_s4 = scalar_lea.hbm %s836_s0, 2048  ;;  %p509_p4 = scmp.lt.u32.totalorder %s682_s25, %s836_s0 }
  0x17   : > { %p506_p2 = pnand %p505_p1, %p504_p0  ;;  %p510_p5 = scmp.lt.u32.totalorder %s508_s4, %s503_s30 }
  0x18   : > { %p512_p8 = scmp.lt.u32.totalorder %s503_s30, %s682_s25 }
  0x19   : > { %p507_p3 = pneg %p506_p2  ;;  %p511_p7 = por %p510_p5, %p509_p4 }
  0x1b   : > { %p513_p10 = por %p512_p8, %p511_p7 }
  0x1d   : > { %p514_p9 = pnand %p513_p10, %p507_p3 }
  0x1f   : > { %517 = shalt.err (!%p514_p9)
}
  0x20   : > { %s518_s13 = scalar_lea.vmem %s690_s27, 1024  ;;  %s601_s14 = smov [#allocation2]  }
  0x21   : > { %p519_p0 = scmp.ne.s32.totalorder %s690_s27, %s518_s13  ;;  %s523_s16 = sshll.u32 %s601_s14, 4  ;;  %s524_s16 = int_to_ptr.vmem [resolvable:$false] %s523_s16 }
  0x22   : > { %s525_s20 = scalar_lea.vmem %s524_s16, 2048  ;;  %p526_p11 = scmp.lt.s32.totalorder %s690_s27, %s524_s16 }
  0x23   : > { %p521_p2 = pnand %p519_p0, %p505_p1  ;;  %p527_p4 = scmp.lt.s32.totalorder %s525_s20, %s518_s13 }
  0x25   : > { %p522_p12 = pneg %p521_p2  ;;  %p528_p5 = por %p527_p4, %p526_p11 }
  0x27   : > { %p529_p7 = pnand %p528_p5, %p522_p12 }
  0x29   : > { %532 = shalt.err (!%p529_p7)
}
  0x2a   : > { %s602_s21 = smov 128   ;;  %s603_s22 = smov 8  }
  0x2b   : > { %458 = dma.hbm_to_vmem [thread:$0]  (!%p686_p13), %s682_s25, 1024, %s690_s27, %s692_s29, %s602_s21, %s602_s21, %s603_s22  }
  0x2c   : > { %p438_p9 = scmp.ge.s32.totalorder %s599_s9, 1  ;;  %p107_p1 = scmp.lt.s32.totalorder %s599_s9, 3 }
  0x2e   : > { %p108_p3 = pnand %p438_p9, %p107_p1 }
  0x2f   : > { %s723_s23 = sand.u32 (!%p108_p3), 1, %s591_s7  }
  0x30   : > { %111 = sbr.rel (%p108_p3) target bundleno = 230 (0xe6), region = 24  ;;  %s439_s24 = sshll.u32 (!%p108_p3), %s723_s23, 6 }
  0x31   : > { %s114_s26 = scalar_lea.sflag (!%p108_p3), [#allocation3], %s723_s23  ;;  %s117_s30 = scalar_lea.vmem (!%p108_p3), [#allocation2], %s439_s24 }
  0x37   : > { %578 = dma.done.wait (%p662_p6), %s114_s26, 1024  }
  0x38   : > { %580 = vsyncadd (%p662_p6), %s114_s26, 4294966272  ;;  %v140_v0 = vld [vmem:[%s117_s30 + $0x10] sm:$0xff]  ;;  %v138_v1 = vld [vmem:[%s117_s30] sm:$0xff]  ;;  %s604_s25 = smov 1   ;;  %s605_s27 = smov 127   ;;  %vm178_vm0 = vcmask 7168  }
  0x39   : > { %158 = vrot.lane.b32.xlu1 %v140_v0, %s604_s25  ;;  %154 = vrot.lane.b32.xlu0 %v138_v1, %s604_s25  ;;  %v141_v2 = vld [vmem:[%s117_s30 + $0x18] sm:$0xff]  ;;  %v139_v3 = vld [vmem:[%s117_s30 + $0x8] sm:$0xff]  ;;  %v187_v14 = vadd.f32 %v138_v1, %v138_v1  ;;  %v189_v18 = vadd.f32 %v140_v0, %v140_v0  ;;  %vm227_vm1 = vcmask 121856   ;;  %vm293_vm2 = vcmask 1046528   ;;  %s756_s17 = scalar_lea.vmem [#allocation5], %s439_s24  ;;  %s450_s28 = sshll.u32 %s640_s10, 10 }
  0x3a   : > { %v143_v4 = vld [vmem:[%s117_s30 + $0x28] sm:$0xff]  ;;  %v142_v5 = vld [vmem:[%s117_s30 + $0x20] sm:$0xff]  ;;  %v145_v6 = vld [vmem:[%s117_s30 + $0x38] sm:$0xff]  ;;  %v188_v15 = vadd.f32 %v139_v3, %v139_v3  ;;  %v190_v21 = vadd.f32 %v141_v2, %v141_v2  ;;  %vm252_vm3 = vcmask 1040384   ;;  %vm334_vm4 = vcmask 130048   ;;  %s358_s29 = sshll.u32 %s756_s17, 4  ;;  %s786_s4 = scalar_lea.hbm %s837_s1, %s450_s28  ;;  %s788_s29 = int_to_ptr.vmem [resolvable:$true] %s358_s29 }
  0x3b   : > { %v144_v7 = vld [vmem:[%s117_s30 + $0x30] sm:$0xff]  ;;  %v192_v22 = vadd.f32 %v143_v4, %v143_v4  ;;  %v191_v25 = vadd.f32 %v142_v5, %v142_v5  ;;  %v194_v26 = vadd.f32 %v145_v6, %v145_v6  ;;  %s344_s10 = scalar_lea.sflag [#allocation4], %s723_s23  ;;  %s533_s5 = scalar_lea.vmem %s788_s29, 1024 }
  0x3c   : > { %v193_v33 = vadd.f32 %v144_v7, %v144_v7  ;;  %p534_p6 = scmp.ne.s32.totalorder %s788_s29, %s533_s5  ;;  %p844_p11 = scmp.ne.s32.totalorder %s841_s18, 0 }
  0x3d   : > { %160 = vrot.lane.b32.xlu1 %v141_v2, %s604_s25  ;;  %156 = vrot.lane.b32.xlu0 %v139_v3, %s604_s25  ;;  %s606_s11 = smov [#allocation5]  }
  0x3e   : > { %p535_p12 = pnand %p534_p6, %p844_p11  ;;  %s537_s13 = sshll.u32 %s606_s11, 4  ;;  %s538_s13 = int_to_ptr.vmem [resolvable:$false] %s537_s13 }
  0x3f   : > { %s539_s14 = scalar_lea.vmem %s538_s13, 2048  ;;  %p540_p8 = scmp.lt.s32.totalorder %s788_s29, %s538_s13 }
  0x40   : > { %p536_p13 = pneg %p535_p12  ;;  %p541_p10 = scmp.lt.s32.totalorder %s539_s14, %s533_s5 }
  0x41   : > { %164 = vrot.lane.b32.xlu1 %v143_v4, %s604_s25  ;;  %162 = vrot.lane.b32.xlu0 %v142_v5, %s604_s25 }
  0x42   : > { %p542_p0 = por %p541_p10, %p540_p8 }
  0x44   : > { %p543_p2 = pnand %p542_p0, %p536_p13 }
  0x45   : > { %168 = vrot.lane.b32.xlu1 %v145_v6, %s604_s25  ;;  %166 = vrot.lane.b32.xlu0 %v144_v7, %s604_s25 }
  0x49   : > { %205 = vrot.lane.b32.xlu1 %v139_v3, %s605_s27  ;;  %203 = vrot.lane.b32.xlu0 %v138_v1, %s605_s27 }
  0x4d   : > { %209 = vrot.lane.b32.xlu1 %v141_v2, %s605_s27  ;;  %207 = vrot.lane.b32.xlu0 %v140_v0, %s605_s27 }
  0x51   : > { %213 = vrot.lane.b32.xlu1 %v143_v4, %s605_s27  ;;  %211 = vrot.lane.b32.xlu0 %v142_v5, %s605_s27 }
  0x55   : > { %217 = vrot.lane.b32.xlu1 %v145_v6, %s605_s27  ;;  %215 = vrot.lane.b32.xlu0 %v144_v7, %s605_s27 }
  0xab   : > { %v159_v8 = vpop.permute.xlu1 %158  ;;  %v155_v9 = vpop.permute.xlu0 %154 }
  0xac   : > { %v179_v19 = vsel %vm178_vm0, 0.0, %v155_v9  ;;  %v181_v23 = vsel %vm178_vm0, 0.0, %v159_v8 }
  0xad   : > { %v195_v27 = vadd.f32 %v187_v14, %v179_v19  ;;  %v197_v36 = vadd.f32 %v189_v18, %v181_v23 }
  0xaf   : > { %v161_v10 = vpop.permute.xlu1 %160  ;;  %v157_v11 = vpop.permute.xlu0 %156 }
  0xb0   : > { %v180_v20 = vsel %vm178_vm0, 0.0, %v157_v11  ;;  %v182_v24 = vsel %vm178_vm0, 0.0, %v161_v10 }
  0xb1   : > { %v196_v28 = vadd.f32 %v188_v15, %v180_v20  ;;  %v198_v37 = vadd.f32 %v190_v21, %v182_v24 }
  0xb3   : > { %v165_v12 = vpop.permute.xlu1 %164  ;;  %v163_v13 = vpop.permute.xlu0 %162 }
  0xb4   : > { %v184_v29 = vsel %vm178_vm0, 0.0, %v165_v12  ;;  %v183_v30 = vsel %vm178_vm0, 0.0, %v163_v13 }
  0xb5   : > { %v200_v40 = vadd.f32 %v192_v22, %v184_v29  ;;  %v199_v41 = vadd.f32 %v191_v25, %v183_v30 }
  0xb7   : > { %v169_v16 = vpop.permute.xlu1 %168  ;;  %v167_v17 = vpop.permute.xlu0 %166 }
  0xb8   : > { %v186_v42 = vsel %vm178_vm0, 0.0, %v169_v16  ;;  %v185_v43 = vsel %vm178_vm0, 0.0, %v167_v17 }
  0xb9   : > { %v202_v54 = vadd.f32 %v194_v26, %v186_v42  ;;  %v201_v8 = vadd.f32 %v193_v33, %v185_v43 }
  0xbb   : > { %v206_v31 = vpop.permute.xlu1 %205  ;;  %v204_v32 = vpop.permute.xlu0 %203 }
  0xbc   : > { %v229_v34 = vsel %vm227_vm1, %v206_v31, 0.0  ;;  %v228_v35 = vsel %vm227_vm1, %v204_v32, 0.0 }
  0xbd   : > { %v237_v38 = vadd.f32 %v229_v34, %v196_v28  ;;  %v236_v39 = vadd.f32 %v228_v35, %v195_v27 }
  0xbf   : > { %v254_v44 = vrot.slane %v237_v38, 7  ;;  %v278_v45 = vadd.f32 %v237_v38, %v237_v38  ;;  %v295_v46 = vrot.slane %v237_v38, 1  ;;  %v253_v47 = vrot.slane %v236_v39, 7  ;;  %v210_v48 = vpop.permute.xlu1 %209  ;;  %v208_v49 = vpop.permute.xlu0 %207 }
  0xc0   : > { %v277_v50 = vadd.f32 %v236_v39, %v236_v39  ;;  %v294_v51 = vrot.slane %v236_v39, 1  ;;  %v231_v52 = vsel %vm227_vm1, %v210_v48, 0.0  ;;  %v230_v53 = vsel %vm227_vm1, %v208_v49, 0.0 }
  0xc1   : > { %v255_v55 = vsel %vm252_vm3, %v253_v47, %v254_v44  ;;  %v273_v56 = vsel %vm252_vm3, 0.0, %v253_v47  ;;  %v239_v57 = vadd.f32 %v231_v52, %v198_v37  ;;  %v238_v61 = vadd.f32 %v230_v53, %v197_v36 }
  0xc2   : > { %v285_v58 = vadd.f32 %v277_v50, %v273_v56  ;;  %v286_v59 = vadd.f32 %v278_v45, %v255_v55  ;;  %v296_v60 = vsel %vm293_vm2, %v294_v51, %v295_v46  ;;  %v314_v62 = vsel %vm293_vm2, %v295_v46, 0.0 }
  0xc3   : > { %v257_v63 = vrot.slane %v239_v57, 7  ;;  %v280_v0 = vadd.f32 %v239_v57, %v239_v57  ;;  %v298_v1 = vrot.slane %v239_v57, 1  ;;  %v214_v2 = vpop.permute.xlu1 %213  ;;  %v212_v3 = vpop.permute.xlu0 %211  ;;  %v256_v6 = vrot.slane %v238_v61, 7 }
  0xc4   : > { %v318_v4 = vadd.f32 %v296_v60, %v285_v58  ;;  %v319_v5 = vadd.f32 %v314_v62, %v286_v59  ;;  %v279_v7 = vadd.f32 %v238_v61, %v238_v61  ;;  %v297_v9 = vrot.slane %v238_v61, 1 }
  0xc5   : > { %v233_v10 = vsel %vm227_vm1, %v214_v2, 0.0  ;;  %v232_v11 = vsel %vm227_vm1, %v212_v3, 0.0  ;;  %v258_v14 = vsel %vm252_vm3, %v256_v6, %v257_v63  ;;  %v274_v15 = vsel %vm252_vm3, 0.0, %v256_v6 }
  0xc6   : > { %v326_v12 = vmul.f32 0.0625, %v318_v4  ;;  %v327_v13 = vmul.f32 0.0625, %v319_v5  ;;  %v287_v16 = vadd.f32 %v279_v7, %v274_v15  ;;  %v288_v17 = vadd.f32 %v280_v0, %v258_v14 }
  0xc7   : > { %v299_v18 = vsel %vm293_vm2, %v297_v9, %v298_v1  ;;  %v241_v19 = vadd.f32 %v233_v10, %v200_v40  ;;  %v218_v20 = vpop.permute.xlu1 %217  ;;  %v216_v21 = vpop.permute.xlu0 %215  ;;  %v315_v22 = vsel %vm293_vm2, %v298_v1, 0.0  ;;  %v240_v23 = vadd.f32 %v232_v11, %v199_v41 }
  0xc8   : > { %335 = vst.msk [vmem:[%s756_s17] sm:$0xff] %vm334_vm4, %v326_v12  ;;  %336 = vst.msk [vmem:[%s756_s17 + $0x8] sm:$0xff] %vm334_vm4, %v327_v13  ;;  %v235_v24 = vsel %vm227_vm1, %v218_v20, 0.0  ;;  %v234_v25 = vsel %vm227_vm1, %v216_v21, 0.0  ;;  %v320_v26 = vadd.f32 %v299_v18, %v287_v16  ;;  %v321_v27 = vadd.f32 %v315_v22, %v288_v17 }
  0xc9   : > { %v260_v28 = vrot.slane %v241_v19, 7  ;;  %v282_v29 = vadd.f32 %v241_v19, %v241_v19  ;;  %v301_v30 = vrot.slane %v241_v19, 1  ;;  %v259_v31 = vrot.slane %v240_v23, 7 }
  0xca   : > { %v281_v32 = vadd.f32 %v240_v23, %v240_v23  ;;  %v300_v33 = vrot.slane %v240_v23, 1  ;;  %v328_v34 = vmul.f32 0.0625, %v320_v26  ;;  %v329_v35 = vmul.f32 0.0625, %v321_v27 }
  0xcb   : > { %v243_v36 = vadd.f32 %v235_v24, %v202_v54  ;;  %v242_v37 = vadd.f32 %v234_v25, %v201_v8  ;;  %v316_v38 = vsel %vm293_vm2, %v301_v30, 0.0  ;;  %v261_v39 = vsel %vm252_vm3, %v259_v31, %v260_v28 }
  0xcc   : > { %v275_v40 = vsel %vm252_vm3, 0.0, %v259_v31  ;;  %v302_v41 = vsel %vm293_vm2, %v300_v33, %v301_v30  ;;  %337 = vst.msk [vmem:[%s756_s17 + $0x10] sm:$0xff] %vm334_vm4, %v328_v34  ;;  %338 = vst.msk [vmem:[%s756_s17 + $0x18] sm:$0xff] %vm334_vm4, %v329_v35  ;;  %v290_v43 = vadd.f32 %v282_v29, %v261_v39 }
  0xcd   : > { %v289_v42 = vadd.f32 %v281_v32, %v275_v40  ;;  %v263_v44 = vrot.slane %v243_v36, 7  ;;  %v284_v45 = vadd.f32 %v243_v36, %v243_v36  ;;  %v304_v46 = vrot.slane %v243_v36, 1 }
  0xce   : > { %v262_v47 = vrot.slane %v242_v37, 7  ;;  %v283_v48 = vadd.f32 %v242_v37, %v242_v37  ;;  %v303_v49 = vrot.slane %v242_v37, 1  ;;  %v323_v51 = vadd.f32 %v316_v38, %v290_v43 }
  0xcf   : > { %v322_v50 = vadd.f32 %v302_v41, %v289_v42  ;;  %v317_v59 = vsel %vm293_vm2, %v304_v46, 0.0 }
  0xd0   : > { %v264_v52 = vsel %vm252_vm3, %v262_v47, %v263_v44  ;;  %v276_v53 = vsel %vm252_vm3, 0.0, %v262_v47  ;;  %v305_v54 = vsel %vm293_vm2, %v303_v49, %v304_v46  ;;  %v331_v56 = vmul.f32 0.0625, %v323_v51 }
  0xd1   : > { %v330_v55 = vmul.f32 0.0625, %v322_v50  ;;  %v291_v57 = vadd.f32 %v283_v48, %v276_v53  ;;  %v292_v58 = vadd.f32 %v284_v45, %v264_v52 }
  0xd2   : > { %340 = vst.msk [vmem:[%s756_s17 + $0x28] sm:$0xff] %vm334_vm4, %v331_v56 }
  0xd3   : > { %339 = vst.msk [vmem:[%s756_s17 + $0x20] sm:$0xff] %vm334_vm4, %v330_v55  ;;  %v324_v60 = vadd.f32 %v305_v54, %v291_v57  ;;  %v325_v61 = vadd.f32 %v317_v59, %v292_v58 }
  0xd5   : > { %v332_v62 = vmul.f32 0.0625, %v324_v60  ;;  %v333_v63 = vmul.f32 0.0625, %v325_v61 }
  0xd7   : > { %341 = vst.msk [vmem:[%s756_s17 + $0x30] sm:$0xff] %vm334_vm4, %v332_v62  ;;  %342 = vst.msk [vmem:[%s756_s17 + $0x38] sm:$0xff] %vm334_vm4, %v333_v63 }
  0xd8   : > { %546 = shalt.err (!%p543_p2)
}
  0xd9   : > { %s547_s16 = scalar_lea.hbm %s786_s4, 1024  ;;  %s551_s22 = scalar_lea.hbm %s837_s1, 2048 }
  0xda   : > { %p548_p4 = scmp.ne.s32.totalorder %s786_s4, %s547_s16  ;;  %p552_p9 = scmp.lt.u32.totalorder %s786_s4, %s837_s1 }
  0xdb   : > { %p553_p1 = scmp.lt.u32.totalorder %s551_s22, %s547_s16  ;;  %p555_p6 = scmp.lt.u32.totalorder %s547_s16, %s786_s4 }
  0xdc   : > { %p549_p5 = pnand %p548_p4, %p844_p11 }
  0xdd   : > { %p554_p3 = por %p553_p1, %p552_p9 }
  0xde   : > { %p550_p7 = pneg %p549_p5 }
  0xdf   : > { %p556_p12 = por %p555_p6, %p554_p3 }
  0xe1   : > { %p557_p13 = pnand %p556_p12, %p550_p7 }
  0xe3   : > { %560 = shalt.err (!%p557_p13)
}
  0xe4   : > { %s607_s30 = smov 128   ;;  %s608_s25 = smov 8  }
  0xe5   : > { %453 = dma.vmem_to_hbm [thread:$0]  (%p844_p11), %s788_s29, 1024, %s786_s4, %s344_s10, %s607_s30, %s607_s30, %s608_s25  }
  0xe6 PF: > { %s373_s27 = sand.u32 1, %s587_s6   ;;  %p845_p8 = scmp.ne.s32.totalorder %s842_s19, 0 }
  0xe7   : > { %p846_p10 = scmp.ge.s32.totalorder %s599_s9, 2  ;;  %s374_s17 = scalar_lea.sflag [#allocation4], %s373_s27 }
  0xe9   : > { %p460_p0 = pnand %p846_p10, %p845_p8 }
  0xeb   : > { %582 = dma.done.wait (!%p460_p0), %s374_s17, 1024  }
  0xec   : > { %584 = vsyncadd (!%p460_p0), %s374_s17, 4294966272  ;;  %p14_p2 = scmp.ge.s32.totalorder %s644_s12, 4   ;;  %s847_s6 = smov %s591_s7 }
  0xed   : > { %s848_s7 = smov %s595_s8  ;;  %s849_s8 = smov %s656_s15 }
  0xee   : > { %s850_s9 = smov %s644_s12  ;;  %16 = sbr.rel (!%p14_p2) target bundleno = 5 (0x5), region = 69 }
  0xf5   :  { %379 = vsyncpa [#allocation3], 1 }
  0xf6   :  { %381 = vsyncpa [#allocation3 + $0x1], 1 }
  0xf7   :  { %382 = vsyncpa [#allocation4], 1 }
  0xf8   :  { %384 = vsyncpa [#allocation4 + $0x1], 1 }

</bundles_post_ra>
